<compile_context>
chip_gen: v7x
topology: tpu7x:2x2x1
jax: 0.10.0
libtpu: 0.0.40
codegen_flags: <defaults>
</compile_context>

<pallas_src>
import jax
import jax.numpy as jnp
from jax import lax
from jax.experimental import pallas as pl
from jax.experimental.pallas import tpu as pltpu


def _mf_kernel(x_all_ref, x_col_ref, s_tab_ref, f_tab_ref, out_ref):
    """Computes one column tile of the [B, B] score matrix.

    out[i, j] = sigmoid(mean_k(se[j,k] * fe[j,k]) + s_bias[i] + f_bias[i])
    (PyTorch's [B] + [B,1] broadcast), so each grid step needs
      * a[j]    for its TB column examples  (fused-table one-hot gather)
      * bias[i] for every row / full batch  (1-wide one-hot gather)
    """
    b_tot = x_all_ref.shape[0]
    tb = x_col_ref.shape[0]
    S, E1 = s_tab_ref.shape
    F = f_tab_ref.shape[0]
    E = E1 - 1

    s_tab = s_tab_ref[...]                                   # [S, E+1]
    f_tab = f_tab_ref[...]                                   # [F, E+1]

    # ---- column path: interaction score a[j] for this tile's TB examples ----
    cidx = x_col_ref[...]                                    # [TB, 2] int32
    oh_s = (lax.broadcasted_iota(jnp.int32, (tb, S), 1) == cidx[:, 0:1]
            ).astype(jnp.float32)                            # [TB, S]
    oh_f = (lax.broadcasted_iota(jnp.int32, (tb, F), 1) == cidx[:, 1:2]
            ).astype(jnp.float32)                            # [TB, F]
    # Fused [emb | bias] tables: one MXU matmul per table gathers the rows.
    gs = jnp.dot(oh_s, s_tab, preferred_element_type=jnp.float32)   # [TB, E+1]
    gf = jnp.dot(oh_f, f_tab, preferred_element_type=jnp.float32)   # [TB, E+1]
    prod = gs[:, :E] * gf[:, :E]                             # [TB, E]
    # mean over E as a [1,E] x [TB,E] contraction: result is lane-oriented
    # [1, TB] (no transpose), 1/E folded into the one-vreg constant, and the
    # cost is O(TB*E) instead of the old O(B^2*E) dot_general.
    w = jnp.full((1, E), 1.0 / E, jnp.float32)
    a_row = lax.dot_general(w, prod, (((1,), (1,)), ((), ())),
                            preferred_element_type=jnp.float32)     # [1, TB]

    # ---- row path: bias[i] for every output row (whole batch) ----
    ridx = x_all_ref[...]                                    # [Btot, 2] int32
    oh_sr = (lax.broadcasted_iota(jnp.int32, (b_tot, S), 1) == ridx[:, 0:1]
             ).astype(jnp.float32)                           # [Btot, S]
    oh_fr = (lax.broadcasted_iota(jnp.int32, (b_tot, F), 1) == ridx[:, 1:2]
             ).astype(jnp.float32)                           # [Btot, F]
    bias = (jnp.dot(oh_sr, s_tab[:, E:E1], preferred_element_type=jnp.float32)
            + jnp.dot(oh_fr, f_tab[:, E:E1], preferred_element_type=jnp.float32)
            )                                                # [Btot, 1]

    # [Btot,1] + [1,TB] -> [Btot,TB]: VPU broadcast-add + EUP sigmoid.
    out_ref[...] = jax.nn.sigmoid(bias + a_row)


def mf_forward(x, s_emb, f_emb, s_bias, f_bias, *, col_tile=None):
    B = x.shape[0]
    # Fuse bias as an extra table column (free: E pads to 128 lanes anyway).
    # TODO(synk): in a real model store the fused table once at init instead
    # of concatenating per call.
    s_tab = jnp.concatenate([s_emb, s_bias], axis=1).astype(jnp.float32)
    f_tab = jnp.concatenate([f_emb, f_bias], axis=1).astype(jnp.float32)
    x = x.astype(jnp.int32)

    # Lane-dense output blocks: last dim is either the full B or a multiple
    # of 128; column tiles run on a "parallel" grid axis (v7x megacore).
    if col_tile is None:
        col_tile = 128 if (B > 128 and B % 128 == 0) else B
    assert B % col_tile == 0, "batch must be divisible by the column tile"
    grid = (B // col_tile,)

    return pl.pallas_call(
        _mf_kernel,
        out_shape=jax.ShapeDtypeStruct((B, B), jnp.float32),
        grid=grid,
        in_specs=[
            pl.BlockSpec((B, 2), lambda j: (0, 0)),          # x: all rows (bias)
            pl.BlockSpec((col_tile, 2), lambda j: (j, 0)),   # x: column tile (a)
            pl.BlockSpec(s_tab.shape, lambda j: (0, 0)),     # fused sample table
            pl.BlockSpec(f_tab.shape, lambda j: (0, 0)),     # fused feature table
        ],
        out_specs=pl.BlockSpec((B, col_tile), lambda j: (0, j)),
        compiler_params=pltpu.CompilerParams(
            dimension_semantics=("parallel",),
            vmem_limit_bytes=32 * 1024 * 1024),
    )(x, x, s_tab, f_tab)


def mf_reference(x, s_emb, f_emb, s_bias, f_bias):
    # Pure-JAX reference mirroring the PyTorch forward (same broadcast quirk).
    se = s_emb[x[:, 0]]
    fe = f_emb[x[:, 1]]
    a = (se * fe).mean(axis=1)                      # [B]
    score = a + s_bias[x[:, 0]] + f_bias[x[:, 1]]   # [B] + [B,1] -> [B,B]
    return jax.nn.sigmoid(score)


if __name__ == "__main__":
    sample_num, feature_num, embedding_size, batch = 16, 12, 32, 8

    key = jax.random.PRNGKey(0)
    k1, k2, k3, k4, k5, k6 = jax.random.split(key, 6)
    # nn.Embedding default init: N(0, 1)
    s_emb = jax.random.normal(k1, (sample_num, embedding_size), jnp.float32)
    f_emb = jax.random.normal(k2, (feature_num, embedding_size), jnp.float32)
    s_bias = jax.random.normal(k3, (sample_num, 1), jnp.float32)
    f_bias = jax.random.normal(k4, (feature_num, 1), jnp.float32)

    sample_idx = jax.random.randint(k5, (batch,), 0, sample_num, jnp.int32)
    feature_idx = jax.random.randint(k6, (batch,), 0, feature_num, jnp.int32)
    x = jnp.stack([sample_idx, feature_idx], axis=1)   # [B, 2] int32

    out = mf_forward(x, s_emb, f_emb, s_bias, f_bias)
    out = jax.block_until_ready(out)

    ref = mf_reference(x, s_emb, f_emb, s_bias, f_bias)
    assert out.shape == (batch, batch)
    assert jnp.allclose(out, ref, atol=1e-5, rtol=1e-5), "mismatch vs reference"
    print("KERNEL_OK")
</pallas_src>

<mosaic_0001>
module attributes {stable_mosaic.version = 11 : i64} {
  func.func @_mf_kernel(%arg0: i32, %arg1: memref<8x2xi32, #tpu.memory_space<vmem>>, %arg2: memref<8x2xi32, #tpu.memory_space<vmem>>, %arg3: memref<16x33xf32, #tpu.memory_space<vmem>>, %arg4: memref<12x33xf32, #tpu.memory_space<vmem>>, %arg5: memref<8x8xf32, #tpu.memory_space<vmem>>) attributes {dimension_semantics = [#tpu.dimension_semantics<parallel>], iteration_bounds = array<i64: 1>, scalar_prefetch = 0 : i64, scratch_operands = 0 : i64, tpu.core_type = #tpu.core_type<tc>, window_params = [{pipeline_mode = #tpu.pipeline_mode<synchronous>, transform_indices = @transform_0, window_bounds = array<i64: 8, 2>}, {transform_indices = @transform_1, window_bounds = array<i64: 8, 2>}, {pipeline_mode = #tpu.pipeline_mode<synchronous>, transform_indices = @transform_2, window_bounds = array<i64: 16, 33>}, {pipeline_mode = #tpu.pipeline_mode<synchronous>, transform_indices = @transform_3, window_bounds = array<i64: 12, 33>}, {transform_indices = @transform_4, window_bounds = array<i64: 8, 8>}]} {
    %c0 = arith.constant 0 : index
    %c0_0 = arith.constant 0 : index
    %0 = vector.load %arg3[%c0, %c0_0] : memref<16x33xf32, #tpu.memory_space<vmem>>, vector<16x33xf32>
    %c0_1 = arith.constant 0 : index
    %c0_2 = arith.constant 0 : index
    %1 = vector.load %arg4[%c0_1, %c0_2] : memref<12x33xf32, #tpu.memory_space<vmem>>, vector<12x33xf32>
    %c0_3 = arith.constant 0 : index
    %c0_4 = arith.constant 0 : index
    %2 = vector.load %arg2[%c0_3, %c0_4] : memref<8x2xi32, #tpu.memory_space<vmem>>, vector<8x2xi32>
    %3 = tpu.iota {dimensions = array<i32: 1>} : vector<8x16xi32>
    %4 = vector.extract_strided_slice %2 {offsets = [0, 0], sizes = [8, 1], strides = [1, 1]} : vector<8x2xi32> to vector<8x1xi32>
    %5 = vector.broadcast %4 : vector<8x1xi32> to vector<8x16xi32>
    %6 = arith.cmpi eq, %3, %5 : vector<8x16xi32>
    %7 = arith.extui %6 : vector<8x16xi1> to vector<8x16xi32>
    %8 = arith.sitofp %7 : vector<8x16xi32> to vector<8x16xf32>
    %9 = tpu.iota {dimensions = array<i32: 1>} : vector<8x12xi32>
    %10 = vector.extract_strided_slice %2 {offsets = [0, 1], sizes = [8, 1], strides = [1, 1]} : vector<8x2xi32> to vector<8x1xi32>
    %11 = vector.broadcast %10 : vector<8x1xi32> to vector<8x12xi32>
    %12 = arith.cmpi eq, %9, %11 : vector<8x12xi32>
    %13 = arith.extui %12 : vector<8x12xi1> to vector<8x12xi32>
    %14 = arith.sitofp %13 : vector<8x12xi32> to vector<8x12xf32>
    %cst = arith.constant dense<0.000000e+00> : vector<8x33xf32>
    %15 = tpu.matmul %8, %0, %cst {dimension_numbers = #tpu.dot_dimension_numbers<[1], [0], [0], [1], [0, 0, 1, 1], [], []>} : vector<8x16xf32>, vector<16x33xf32>, vector<8x33xf32> -> vector<8x33xf32>
    %cst_5 = arith.constant dense<0.000000e+00> : vector<8x33xf32>
    %16 = tpu.matmul %14, %1, %cst_5 {dimension_numbers = #tpu.dot_dimension_numbers<[1], [0], [0], [1], [0, 0, 1, 1], [], []>} : vector<8x12xf32>, vector<12x33xf32>, vector<8x33xf32> -> vector<8x33xf32>
    %17 = vector.extract_strided_slice %15 {offsets = [0, 0], sizes = [8, 32], strides = [1, 1]} : vector<8x33xf32> to vector<8x32xf32>
    %18 = vector.extract_strided_slice %16 {offsets = [0, 0], sizes = [8, 32], strides = [1, 1]} : vector<8x33xf32> to vector<8x32xf32>
    %19 = arith.mulf %17, %18 : vector<8x32xf32>
    %cst_6 = arith.constant 3.125000e-02 : f32
    %20 = vector.broadcast %cst_6 : f32 to vector<1x32xf32>
    %cst_7 = arith.constant dense<0.000000e+00> : vector<1x8xf32>
    %21 = tpu.matmul %20, %19, %cst_7 {dimension_numbers = #tpu.dot_dimension_numbers<[1], [1], [0], [0], [0, 0, 1, 0], [], []>} : vector<1x32xf32>, vector<8x32xf32>, vector<1x8xf32> -> vector<1x8xf32>
    %c0_8 = arith.constant 0 : index
    %c0_9 = arith.constant 0 : index
    %22 = vector.load %arg1[%c0_8, %c0_9] : memref<8x2xi32, #tpu.memory_space<vmem>>, vector<8x2xi32>
    %23 = tpu.iota {dimensions = array<i32: 1>} : vector<8x16xi32>
    %24 = vector.extract_strided_slice %22 {offsets = [0, 0], sizes = [8, 1], strides = [1, 1]} : vector<8x2xi32> to vector<8x1xi32>
    %25 = vector.broadcast %24 : vector<8x1xi32> to vector<8x16xi32>
    %26 = arith.cmpi eq, %23, %25 : vector<8x16xi32>
    %27 = arith.extui %26 : vector<8x16xi1> to vector<8x16xi32>
    %28 = arith.sitofp %27 : vector<8x16xi32> to vector<8x16xf32>
    %29 = tpu.iota {dimensions = array<i32: 1>} : vector<8x12xi32>
    %30 = vector.extract_strided_slice %22 {offsets = [0, 1], sizes = [8, 1], strides = [1, 1]} : vector<8x2xi32> to vector<8x1xi32>
    %31 = vector.broadcast %30 : vector<8x1xi32> to vector<8x12xi32>
    %32 = arith.cmpi eq, %29, %31 : vector<8x12xi32>
    %33 = arith.extui %32 : vector<8x12xi1> to vector<8x12xi32>
    %34 = arith.sitofp %33 : vector<8x12xi32> to vector<8x12xf32>
    %35 = vector.extract_strided_slice %0 {offsets = [0, 32], sizes = [16, 1], strides = [1, 1]} : vector<16x33xf32> to vector<16x1xf32>
    %cst_10 = arith.constant dense<0.000000e+00> : vector<8x1xf32>
    %36 = tpu.matmul %28, %35, %cst_10 {dimension_numbers = #tpu.dot_dimension_numbers<[1], [0], [0], [1], [0, 0, 1, 1], [], []>} : vector<8x16xf32>, vector<16x1xf32>, vector<8x1xf32> -> vector<8x1xf32>
    %37 = vector.extract_strided_slice %1 {offsets = [0, 32], sizes = [12, 1], strides = [1, 1]} : vector<12x33xf32> to vector<12x1xf32>
    %cst_11 = arith.constant dense<0.000000e+00> : vector<8x1xf32>
    %38 = tpu.matmul %34, %37, %cst_11 {dimension_numbers = #tpu.dot_dimension_numbers<[1], [0], [0], [1], [0, 0, 1, 1], [], []>} : vector<8x12xf32>, vector<12x1xf32>, vector<8x1xf32> -> vector<8x1xf32>
    %39 = arith.addf %36, %38 : vector<8x1xf32>
    %40 = vector.broadcast %39 : vector<8x1xf32> to vector<8x8xf32>
    %41 = vector.broadcast %21 : vector<1x8xf32> to vector<8x8xf32>
    %42 = arith.addf %40, %41 : vector<8x8xf32>
    %43 = arith.negf %42 : vector<8x8xf32>
    %44 = math.exp %43 : vector<8x8xf32>
    %cst_12 = arith.constant 1.000000e+00 : f32
    %45 = vector.broadcast %cst_12 : f32 to vector<8x8xf32>
    %46 = arith.addf %45, %44 : vector<8x8xf32>
    %47 = arith.divf %45, %46 : vector<8x8xf32>
    %c0_13 = arith.constant 0 : index
    %c0_14 = arith.constant 0 : index
    %48 = vector.load %arg5[%c0_13, %c0_14] : memref<8x8xf32, #tpu.memory_space<vmem>>, vector<8x8xf32>
    tpu.vector_store %arg5[%c0_13, %c0_14], %47 {strides = array<i32>} : memref<8x8xf32, #tpu.memory_space<vmem>>, vector<8x8xf32>,
    return
  }
  func.func @transform_0(%arg0: i32) -> (i32, i32) {
    %c0_i32 = arith.constant 0 : i32
    %c0_i32_0 = arith.constant 0 : i32
    %c0_i32_1 = arith.constant 0 : i32
    return %c0_i32, %c0_i32_0 : i32, i32
  }
  func.func @transform_1(%arg0: i32) -> (i32, i32) {
    %c0_i32 = arith.constant 0 : i32
    %c0_i32_0 = arith.constant 0 : i32
    return %arg0, %c0_i32 : i32, i32
  }
  func.func @transform_2(%arg0: i32) -> (i32, i32) {
    %c0_i32 = arith.constant 0 : i32
    %c0_i32_0 = arith.constant 0 : i32
    %c0_i32_1 = arith.constant 0 : i32
    return %c0_i32, %c0_i32_0 : i32, i32
  }
  func.func @transform_3(%arg0: i32) -> (i32, i32) {
    %c0_i32 = arith.constant 0 : i32
    %c0_i32_0 = arith.constant 0 : i32
    %c0_i32_1 = arith.constant 0 : i32
    return %c0_i32, %c0_i32_0 : i32, i32
  }
  func.func @transform_4(%arg0: i32) -> (i32, i32) {
    %c0_i32 = arith.constant 0 : i32
    %c0_i32_0 = arith.constant 0 : i32
    return %c0_i32, %arg0 : i32, i32
  }
}

</mosaic_0001>

<bundles_post_ra>
// kernel: tpu_custom_call.1
= control target key start
LH: loop header
LB: loop body
LE: loop exit
PB: predicated region body
PF: predicated region fallthrough
CT: control target
= control target key end

     0   :  { %9 = vsyncpa [#allocation3], 0  ;;  %s732_s0 = inlined_call_operand.vmem [shape: s32[8,2], index: 0, kind: input, shape index: {}]   ;;  %s733_s1 = inlined_call_operand.vmem [shape: s32[8,2], index: 1, kind: input, shape index: {}]   ;;  %s734_s2 = inlined_call_operand.vmem [shape: f32[16,33], index: 2, kind: input, shape index: {}]   ;;  %s735_s3 = inlined_call_operand.hbm [shape: f32[12,33], index: 3, kind: input, shape index: {}]   ;;  %s736_s4 = inlined_call_operand.hbm [shape: f32[8,8], index: 4, kind: output, shape index: {}]  }
   0x1   :  { %10 = vsyncpa [#allocation4], 0  ;;  %s644_s15 = smov [#allocation2]   ;;  %s596_s19 = scalar_lea.hbm %s735_s3, 256 }
   0x2   :  { %s22_s16 = sshll.u32 %s644_s15, 4  ;;  %p597_p0 = scmp.ne.s32.totalorder %s735_s3, %s596_s19  ;;  %s23_s16 = int_to_ptr.vmem [resolvable:$true] %s22_s16 }
   0x3   :  { %p600_p1 = scmp.lt.u32.totalorder %s596_s19, %s735_s3 }
   0x5   :  { %p602_p2 = pnand %p600_p1, %p597_p0 }
   0x7   :  { %605 = shalt.err (!%p602_p2)
}
   0x8   :  { %s606_s24 = scalar_lea.vmem %s23_s16, 256  ;;  %p611_p4 = scmp.lt.s32.totalorder %s23_s16, %s23_s16 }
   0x9   :  { %p607_p3 = scmp.ne.s32.totalorder %s23_s16, %s606_s24  ;;  %p612_p5 = scmp.lt.s32.totalorder %s606_s24, %s606_s24 }
   0xb   :  { %p613_p6 = por %p612_p5, %p611_p4 }
   0xd   :  { %p614_p7 = pnand %p613_p6, %p607_p3 }
   0xf   :  { %617 = shalt.err (!%p614_p7)
}
  0x10   :  { %s645_s25 = smov 128   ;;  %s646_s26 = smov 8  }
  0x11   :  { %28 = dma.hbm_to_vmem [thread:$0]  %s735_s3, 256, %s23_s16, [#allocation3], %s645_s25, %s645_s25, %s646_s26  }
  0x12   :  { %640 = dma.done.wait [#allocation3], 256  }
  0x13   :  { %641 = vsyncadd [#allocation3], 4294967040  ;;  %v647_v0 = vmov 1   ;;  %v648_v1 = vmov 0   ;;  %v649_v2 = vmov 0.0|0.0   ;;  %v281_v3 = vld [vmem:[%s732_s0] sm:$0xff]  ;;  %v37_v15 = vlaneseq }
  0x14   :  { %579 = vset.pattern.permute.xlu1 %v647_v0  ;;  %577 = vset.pattern.permute.xlu0 %v648_v1  ;;  %v36_v4 = vld [vmem:[%s733_s1] sm:$0xff]  ;;  %v34_v5 = vld [vmem:[#allocation2] sm:$0xff]  ;;  %v33_v8 = vld [vmem:[%s734_s2 + $0x8] sm:$0xff]  ;;  %vm650_vm0 = vmmov 0   ;;  %v651_v11 = vmov 0.0   ;;  %vm129_vm1 = vcmask 1043456  }
  0x15   :  { %549 = vmatprep.subr.bf16.mxu0 %v649_v2  ;;  %552 = vmatprep.subr.bf16.mxu1 %v649_v2  ;;  %v35_v6 = vld [vmem:[#allocation2 + $0x8] sm:$0xf]  ;;  %vm652_vm2 = vmmov 1   ;;  %s653_s0 = smov 96   ;;  %v38_v16 = vand.u32 127, %v37_v15  ;;  %vm51_vm4 = vcmask 130048  }
  0x16   :  { %289 = vperm.xlu1 %579, %v281_v3   ;;  %40 = vperm.xlu0 %577, %v36_v4   ;;  %v32_v7 = vld [vmem:[%s734_s2] sm:$0xff]  ;;  %v580_v9 = vpack.i.bf16 %v35_v6, %v34_v5  ;;  %v553_v12 = vpack.c.bf16 %v35_v6, %v34_v5  ;;  %vm707_vm3 = vmpackc.low %vm129_vm1, %vm652_vm2  ;;  %vm125_vm6 = vcmask 97280   ;;  %vm204_vm10 = vcmask 261120   ;;  %s655_s1 = smov [#allocation5]  }
  0x17   :  { %v550_v10 = vpack.c.bf16 %v33_v8, %v32_v7  ;;  %520 = vmatprep.mubr.msk.f32.mxu0 %vm650_vm0, %v651_v11  ;;  %527 = vmatprep.mubr.msk.f32.mxu1 %vm650_vm0, %v651_v11  ;;  %v586_v14 = vpack.i.bf16 %v33_v8, %v32_v7  ;;  %v654_v38 = vmov 0.03125   ;;  %v462_v41 = vshrl.u32 %v37_v15, 7  ;;  %s480_s2 = sshll.u32 %s655_s1, 4  ;;  %s481_s2 = int_to_ptr.vmem [resolvable:$true] %s480_s2 }
  0x18   :  { %555 = vmatpush3.bf16.msk.msra.mxu1 %vm707_vm3, %v553_v12  ;;  %vm472_vm11 = vcmask 64512   ;;  %s618_s10 = scalar_lea.vmem %s481_s2, 128  ;;  %p623_p9 = scmp.lt.s32.totalorder %s481_s2, %s481_s2 }
  0x19   :  { %551 = vmatpush3.bf16.msra.mxu0 %v550_v10  ;;  %556 = vmatprep.subr.bf16.mxu1 %v649_v2  ;;  %v463_v42 = vsub.s32 0, %v462_v41  ;;  %p619_p8 = scmp.ne.s32.totalorder %s481_s2, %s618_s10  ;;  %p624_p10 = scmp.lt.s32.totalorder %s618_s10, %s618_s10 }
  0x1a   :  { %578 = vset.pattern.permute.xlu0 %v647_v0  ;;  %581 = vrot.lane.b32.xlu1 %v580_v9, %s653_s0 }
  0x1b   :  { %46 = vperm.xlu0 %578, %v36_v4   ;;  %585 = vset.pattern.permute.xlu1 %v648_v1  ;;  %p625_p11 = por %p624_p10, %p623_p9 }
  0x1c   :  { %530 = vmatprep.subr.mxu0 %v651_v11 }
  0x1d   :  { %p626_p12 = pnand %p625_p11, %p619_p8 }
  0x1e   :  { %283 = vperm.xlu1 %585, %v281_v3  }
  0x1f   :  { %587 = vrot.lane.b32.xlu0 %v586_v14, %s653_s0 }
  0x20   :  { %591 = vset.pattern.permute.xlu0 %v648_v1 }
  0x95   :  { %v290_v17 = vpop.permute.xlu1 %289  ;;  %v41_v18 = vpop.permute.xlu0 %40 }
  0x96   :  { %vm42_vm5 = vcmp.eq.s32.totalorder %v38_v16, %v41_v18  ;;  %vm291_vm7 = vcmp.eq.s32.totalorder %v38_v16, %v290_v17 }
  0x97   :  { %v489_v19 = vsel %vm42_vm5, 1.0, %v651_v11  ;;  %v497_v26 = vsel %vm291_vm7, 1.0, %v651_v11 }
  0x98   :  { %521 = vmatmul.mubr.msk.f32.vlgmr.msra.gmra.mrb[0].mxu0 %vm51_vm4, %v489_v19 }
  0x99   :  { %v582_v20 = vpop.permute.xlu1 %581  ;;  %532 = vmatprep.mubr.msk.f32.mxu0 %vm650_vm0, %v651_v11 }
  0x9a   :  { %v584_v21 = vunpack.i.h.bf16 %v582_v20  ;;  %v583_v22 = vunpack.i.l.bf16 %v582_v20  ;;  %v47_v23 = vpop.permute.xlu0 %46 }
  0x9b   :  { %vm48_vm8 = vcmp.eq.s32.totalorder %v38_v16, %v47_v23 }
  0x9c   :  { %v557_v24 = vpack.c.bf16 %v584_v21, %v583_v22  ;;  %v490_v25 = vsel %vm48_vm8, 1.0, %v651_v11 }
  0x9d   :  { %528 = vmatmul.mubr.msk.f32.vlgmr.msra.gmra.mrb[0].mxu1 %vm125_vm6, %v490_v25  ;;  %v284_v30 = vpop.permute.xlu1 %283 }
  0x9e   :  { %559 = vmatpush3.bf16.msk.msra.mxu1 %vm707_vm3, %v557_v24  ;;  %539 = vmatprep.mubr.msk.f32.mxu1 %vm650_vm0, %v651_v11  ;;  %v588_v27 = vpop.permute.xlu0 %587  ;;  %vm285_vm9 = vcmp.eq.s32.totalorder %v38_v16, %v284_v30 }
  0x9f   :  { %v590_v28 = vunpack.i.h.bf16 %v588_v27  ;;  %v589_v29 = vunpack.i.l.bf16 %v588_v27  ;;  %560 = vmatprep.subr.bf16.mxu1 %v649_v2  ;;  %v496_v32 = vsel %vm285_vm9, 1.0, %v651_v11 }
  0xa1   :  { %540 = vmatmul.mubr.msk.f32.vlgmr.msra.gmra.mrb[2].mxu1 %vm125_vm6, %v497_v26  ;;  %v561_v31 = vpack.c.bf16 %v590_v28, %v589_v29 }
  0xa2   :  { %546 = vmatprep.mubr.msk.f32.mxu1 %vm650_vm0, %v651_v11 }
  0xa3   :  { %562 = vmatpush3.bf16.msra.mxu1 %v561_v31 }
  0xa9   :  { %547 = vmatmul.mubr.msk.f32.vlgmr.msra.gmra.mrb[2].mxu1 %vm51_vm4, %v496_v32 }
 0x16b   :  { %v121_v33 = vpop.f32.mrb[0].mxu0 }
 0x16c   :  { %v522_v34 = vpop.f32.mrb[1].mxu0 }
 0x170   :  { %v199_v35 = vpop.f32.mrb[0].mxu1 }
 0x171   :  { %v203_v36 = vmul.f32 %v199_v35, %v121_v33  ;;  %v529_v37 = vpop.f32.mrb[1].mxu1 }
 0x173   :  { %531 = vmatpush3.xpose.msk.msra.mxu0 %vm204_vm10, %v203_v36 }
 0x176   :  { %533 = vmatmul.mubr.msk.f32.vlgmr.msra.gmra.mrb[2].mxu0 %vm204_vm10, %v654_v38 }
 0x17c   :  { %v452_v39 = vpop.f32.mrb[2].mxu1 }
 0x17d   :  { %458 = vperm.xlu1 %585, %v452_v39   ;;  %v548_v40 = vpop.f32.mrb[3].mxu1 }
 0x1fc   :  { %v459_v46 = vpop.permute.xlu1 %458 }
 0x249   :  { %v277_v43 = vpop.f32.mrb[2].mxu0 }
 0x24a   :  { %v464_v44 = vrot.slane %v277_v43, %v463_v42  ;;  %v534_v45 = vpop.f32.mrb[3].mxu0 }
 0x24c   :  { %v465_v47 = vadd.f32 %v464_v44, %v459_v46 }
 0x24e   :  { %v501_v48 = vmul.f32 -1.442695, %v465_v47 }
 0x250   :  { %592 = vpow2.f32 %v501_v48 }
 0x25a   :  { %v593_v49 = vpop.eup %592 }
 0x25b   :  { %v469_v50 = vadd.f32 1.0, %v593_v49 }
 0x25d   :  { %594 = vrcp.f32 %v469_v50 }
 0x267   :  { %v595_v51 = vpop.eup %594 }
 0x268   :  { %473 = vst.msk [vmem:[#allocation5] sm:$0xff] %vm472_vm11, %v595_v51 }
 0x269   :  { %629 = shalt.err (!%p626_p12)
}
 0x26a   :  { %s630_s13 = scalar_lea.hbm %s736_s4, 128 }
 0x26b   :  { %p631_p13 = scmp.ne.s32.totalorder %s736_s4, %s630_s13  ;;  %p634_p0 = scmp.lt.u32.totalorder %s630_s13, %s736_s4 }
 0x26d   :  { %p636_p1 = pnand %p634_p0, %p631_p13 }
 0x26f   :  { %639 = shalt.err (!%p636_p1)
}
 0x270   :  { %483 = dma.vmem_to_hbm [thread:$0]  %s481_s2, 128, %s736_s4, [#allocation4]  }
 0x271   :  { %642 = dma.done.wait [#allocation4], 128  }
 0x272   :  { %643 = vsyncadd [#allocation4], 4294967168 }
 0x273   :  { %487 = vsyncpa [#allocation3], 1 }
 0x274   :  { %488 = vsyncpa [#allocation4], 1 }

</bundles_post_ra>
